<compile_context>
chip_gen: v5e
topology: v5e:2x2
jax: 0.10.0
libtpu: 0.0.40
codegen_flags: <defaults>
</compile_context>

<pallas_src>
import functools

import jax
import jax.numpy as jnp
from jax.experimental import pallas as pl
from jax.experimental.pallas import tpu as pltpu

EPS = 1e-5  # nn.InstanceNorm2d default (affine=False -> no gamma/beta)


def _instance_norm(y):
    # y: [Cp, HW] f32; normalize each channel over its spatial extent (biased var).
    m = jnp.mean(y, axis=1, keepdims=True)
    d = y - m
    v = jnp.mean(d * d, axis=1, keepdims=True)   # reuse the (y - mean) temporary
    return d * jax.lax.rsqrt(v + EPS)


def _elu(y):
    # ELU with alpha=1.0 (PyTorch default); overflow-safe.
    return jnp.where(y > 0.0, y, jnp.exp(jnp.minimum(y, 0.0)) - 1.0)


def _edge_masks(Cp, H, W):
    # Channel-independent edge masks: iota and `% W` run at spatial-only shape (1, HW),
    # then a cheap native i32 sublane-broadcast expands over channels before the
    # comparisons (no per-channel integer iota/mod work).  Under the production spatial
    # tiling (TODO above) these become per-tile and tiny.
    HW = H * W
    pos1 = jax.lax.broadcasted_iota(jnp.int32, (1, HW), 1)
    col1 = pos1 % W
    pos = jnp.broadcast_to(pos1, (Cp, HW))
    col = jnp.broadcast_to(col1, (Cp, HW))
    return (col == 0, col == W - 1, pos < W, pos >= (H - 1) * W)


def _reflect_taps_bf16(x, masks, H, W):
    """x: [Cp, HW] f32, lane-dense.  Returns the 9 reflect-padded 3x3 taps, each
    already cast to bf16, ordered t = ky*3 + kx with
        taps[t][c, h*W + w] == x[c, refl(h+ky-1), refl(w+kx-1)].
    Shifts are XLU lane rotations; image edges are fixed with one masked select each.
    Only the bf16 copies are kept across the loop; f32 intermediates are transient."""
    HW = H * W
    is_col0, is_colL, is_row0, is_rowL = masks

    def lroll(a, k):
        # out[..., p] = a[..., (p + k) % HW]  (jnp.roll convention, static shift)
        return pltpu.roll(a, (-k) % HW, axis=1)

    # Horizontal (kx) variants -- built once, shared across all ky and all output
    # channels (slice/rotate work is O(9) per conv, not O(C*C*9)).
    x_nxt = lroll(x, 1)     # reads column w+1
    x_prv = lroll(x, -1)    # reads column w-1
    h_vars = (
        jnp.where(is_col0, x_nxt, x_prv),   # kx=0: w-1, reflected at w=0     -> w=1
        x,                                  # kx=1: w
        jnp.where(is_colL, x_prv, x_nxt),   # kx=2: w+1, reflected at w=W-1   -> W-2
    )

    taps = [None] * 9
    for kx in range(3):
        a = h_vars[kx]
        a_dn = lroll(a, W)    # reads row h+1
        a_up = lroll(a, -W)   # reads row h-1
        taps[0 * 3 + kx] = jnp.where(is_row0, a_dn, a_up).astype(jnp.bfloat16)  # ky=0
        taps[1 * 3 + kx] = a.astype(jnp.bfloat16)                               # ky=1
        taps[2 * 3 + kx] = jnp.where(is_rowL, a_up, a_dn).astype(jnp.bfloat16)  # ky=2
    return taps


def _conv3x3(x, w_ref, masks, H, W):
    # x: [Cp, HW] f32; w_ref: VMEM [Cp, 9*Cp] bf16 with
    #   w_ref[o, (ky*3+kx)*Cp + c] = weight[o, c, ky, kx].
    # Single K = 9*Cp MXU contraction, f32 accumulation (no per-tap VPU adds).
    # Bias intentionally omitted: exactly cancelled by the following non-affine
    # InstanceNorm (per-channel constants vanish under mean subtraction).
    taps = _reflect_taps_bf16(x, masks, H, W)
    taps_cat = jnp.concatenate(taps, axis=0)          # [9*Cp, HW] bf16
    return jnp.dot(w_ref[...], taps_cat, preferred_element_type=jnp.float32)


def _res_block_kernel(x_ref, w1_ref, w2_ref, out_ref, *, H, W):
    Cp = x_ref.shape[1]
    x = x_ref[0].astype(jnp.float32)              # [Cp, HW]
    masks = _edge_masks(Cp, H, W)                 # built once, reused by both convs

    # conv1 (reflect pad) -> InstanceNorm -> ELU
    y = _conv3x3(x, w1_ref, masks, H, W)
    y = _elu(_instance_norm(y))

    # conv2 (reflect pad) -> InstanceNorm
    y = _conv3x3(y, w2_ref, masks, H, W)
    y = _instance_norm(y)

    # residual add
    out_ref[0] = (x + y).astype(out_ref.dtype)


def _pack_weights(w, Cp):
    # [C, C, 3, 3] -> [Cp, 9*Cp] bf16 with [o, (ky*3+kx)*Cp + c] = w[o, c, ky, kx].
    C = w.shape[0]
    w_pad = jnp.pad(w.astype(jnp.float32), ((0, Cp - C), (0, Cp - C), (0, 0), (0, 0)))
    return jnp.transpose(w_pad, (0, 2, 3, 1)).reshape(Cp, 9 * Cp).astype(jnp.bfloat16)


def residual_block(x, w1, b1, w2, b2):
    """x: [B, C, H, W]; w*: [C, C, 3, 3]; b*: [C].

    The biases are accepted for API parity with the PyTorch module but are
    mathematically no-ops (each conv feeds a non-affine InstanceNorm), so they are
    not plumbed into the kernel."""
    B, C, H, W = x.shape
    if H < 2 or W < 2:
        raise ValueError("reflect padding of 1 requires H >= 2 and W >= 2")
    del b1, b2  # cancelled exactly by InstanceNorm's mean subtraction
    HW = H * W
    Cp = ((C + 15) // 16) * 16   # sublane fill (f32) + bf16 packed-tile alignment

    # Lane-dense layout: flatten spatial dims; zero-pad channels (sliced off below).
    x_flat = jnp.pad(x.reshape(B, C, HW), ((0, 0), (0, Cp - C), (0, 0)))
    w1c = _pack_weights(w1, Cp)
    w2c = _pack_weights(w2, Cp)

    kernel = functools.partial(_res_block_kernel, H=H, W=W)
    out_flat = pl.pallas_call(
        kernel,
        out_shape=jax.ShapeDtypeStruct((B, Cp, HW), x.dtype),
        grid=(B,),
        in_specs=[
            pl.BlockSpec((1, Cp, HW), lambda b: (b, 0, 0)),
            pl.BlockSpec((Cp, 9 * Cp), lambda b: (0, 0)),   # weights resident in VMEM
            pl.BlockSpec((Cp, 9 * Cp), lambda b: (0, 0)),
        ],
        out_specs=pl.BlockSpec((1, Cp, HW), lambda b: (b, 0, 0)),
        compiler_params=pltpu.CompilerParams(
            dimension_semantics=("parallel",),
        ),
    )(x_flat, w1c, w2c)
    return out_flat[:, :C, :].reshape(B, C, H, W)


def _reference(x, w1, b1, w2, b2):
    # Pure-JAX f32 reference for the PyTorch module (reflect pad -> conv -> IN -> ELU
    # -> reflect pad -> conv -> IN, plus residual add).  Biases ARE applied here.
    def conv(a, w, b):
        ap = jnp.pad(a, ((0, 0), (0, 0), (1, 1), (1, 1)), mode="reflect")
        y = jax.lax.conv_general_dilated(
            ap, w, window_strides=(1, 1), padding="VALID",
            dimension_numbers=("NCHW", "OIHW", "NCHW"))
        return y + b[None, :, None, None]

    def inorm(y):
        m = jnp.mean(y, axis=(2, 3), keepdims=True)
        v = jnp.mean((y - m) ** 2, axis=(2, 3), keepdims=True)
        return (y - m) * jax.lax.rsqrt(v + EPS)

    y = inorm(conv(x, w1, b1))
    y = jnp.where(y > 0.0, y, jnp.expm1(jnp.minimum(y, 0.0)))
    y = inorm(conv(y, w2, b2))
    return x + y


if __name__ == "__main__":
    B, C, H, W = 2, 4, 16, 16

    key = jax.random.PRNGKey(0)
    kx_, kw1, kb1, kw2, kb2 = jax.random.split(key, 5)

    x = jax.random.normal(kx_, (B, C, H, W), dtype=jnp.float32)
    # Deterministic synthetic parameters (Conv2d(C, C, 3) x 2; InstanceNorm has none).
    w1 = 0.1 * jax.random.normal(kw1, (C, C, 3, 3), dtype=jnp.float32)
    b1 = 0.1 * jax.random.normal(kb1, (C,), dtype=jnp.float32)
    w2 = 0.1 * jax.random.normal(kw2, (C, C, 3, 3), dtype=jnp.float32)
    b2 = 0.1 * jax.random.normal(kb2, (C,), dtype=jnp.float32)

    out = residual_block(x, w1, b1, w2, b2)
    jax.block_until_ready(out)
    assert out.shape == (B, C, H, W)

    # Correctness check vs. pure-JAX reference (covers reflect-tap roll direction and
    # the bias-cancellation argument).  bf16 MXU operands -> loose tolerance.
    ref = _reference(x, w1, b1, w2, b2)
    err = float(jnp.max(jnp.abs(out - ref)))
    assert err < 1.5e-1, f"max abs err vs reference: {err}"

    print("KERNEL_OK")
</pallas_src>

<mosaic_0001>
module attributes {stable_mosaic.version = 11 : i64} {
  func.func @_res_block_kernel(%arg0: i32, %arg1: memref<1x16x256xf32, #tpu.memory_space<vmem>>, %arg2: memref<16x144xbf16, #tpu.memory_space<vmem>>, %arg3: memref<16x144xbf16, #tpu.memory_space<vmem>>, %arg4: memref<1x16x256xf32, #tpu.memory_space<vmem>>) attributes {dimension_semantics = [#tpu.dimension_semantics<parallel>], iteration_bounds = array<i64: 2>, scalar_prefetch = 0 : i64, scratch_operands = 0 : i64, tpu.core_type = #tpu.core_type<tc>, window_params = [{transform_indices = @transform_0, window_bounds = array<i64: 1, 16, 256>}, {pipeline_mode = #tpu.pipeline_mode<synchronous>, transform_indices = @transform_1, window_bounds = array<i64: 16, 144>}, {pipeline_mode = #tpu.pipeline_mode<synchronous>, transform_indices = @transform_2, window_bounds = array<i64: 16, 144>}, {transform_indices = @transform_3, window_bounds = array<i64: 1, 16, 256>}]} {
    %c0 = arith.constant 0 : index
    %c0_0 = arith.constant 0 : index
    %c0_1 = arith.constant 0 : index
    %0 = vector.load %arg1[%c0, %c0_0, %c0_1] : memref<1x16x256xf32, #tpu.memory_space<vmem>>, vector<1x16x256xf32>
    %1 = vector.shape_cast %0 : vector<1x16x256xf32> to vector<16x256xf32>
    %2 = tpu.iota {dimensions = array<i32: 1>} : vector<1x256xi32>
    %c16_i32 = arith.constant 16 : i32
    %c0_i32 = arith.constant 0 : i32
    %3 = arith.cmpi eq, %c16_i32, %c0_i32 : i32
    %c1_i32 = arith.constant 1 : i32
    %4 = arith.select %3, %c1_i32, %c16_i32 : i32
    %5 = vector.broadcast %4 : i32 to vector<1x256xi32>
    %6 = arith.remsi %2, %5 : vector<1x256xi32>
    %c0_i32_2 = arith.constant 0 : i32
    %7 = vector.broadcast %c0_i32_2 : i32 to vector<1x256xi32>
    %8 = arith.cmpi ne, %6, %7 : vector<1x256xi32>
    %c0_i32_3 = arith.constant 0 : i32
    %9 = vector.broadcast %c0_i32_3 : i32 to vector<1x256xi32>
    %10 = arith.cmpi slt, %6, %9 : vector<1x256xi32>
    %c0_i32_4 = arith.constant 0 : i32
    %11 = arith.cmpi slt, %4, %c0_i32_4 : i32
    %12 = vector.broadcast %11 : i1 to vector<1x256xi1>
    %13 = vector.broadcast %12 : vector<1x256xi1> to vector<1x256xi1>
    %14 = arith.xori %10, %13 : vector<1x256xi1>
    %15 = arith.andi %14, %8 : vector<1x256xi1>
    %16 = vector.broadcast %4 : i32 to vector<1x256xi32>
    %17 = arith.addi %6, %16 : vector<1x256xi32>
    %18 = arith.select %15, %17, %6 : vector<1x256xi1>, vector<1x256xi32>
    %19 = vector.shape_cast %2 : vector<1x256xi32> to vector<1x256xi32>
    %20 = vector.broadcast %19 : vector<1x256xi32> to vector<16x256xi32>
    %21 = vector.shape_cast %18 : vector<1x256xi32> to vector<1x256xi32>
    %22 = vector.broadcast %21 : vector<1x256xi32> to vector<16x256xi32>
    %c0_i32_5 = arith.constant 0 : i32
    %23 = vector.broadcast %c0_i32_5 : i32 to vector<16x256xi32>
    %24 = arith.cmpi eq, %22, %23 : vector<16x256xi32>
    %c15_i32 = arith.constant 15 : i32
    %25 = vector.broadcast %c15_i32 : i32 to vector<16x256xi32>
    %26 = arith.cmpi eq, %22, %25 : vector<16x256xi32>
    %c16_i32_6 = arith.constant 16 : i32
    %27 = vector.broadcast %c16_i32_6 : i32 to vector<16x256xi32>
    %28 = arith.cmpi slt, %20, %27 : vector<16x256xi32>
    %c240_i32 = arith.constant 240 : i32
    %29 = vector.broadcast %c240_i32 : i32 to vector<16x256xi32>
    %30 = arith.cmpi sge, %20, %29 : vector<16x256xi32>
    %c255_i32 = arith.constant 255 : i32
    %31 = tpu.dynamic_rotate %1 by %c255_i32 dim 1 : vector<16x256xf32>, i32 -> vector<16x256xf32>
    %c1_i32_7 = arith.constant 1 : i32
    %32 = tpu.dynamic_rotate %1 by %c1_i32_7 dim 1 : vector<16x256xf32>, i32 -> vector<16x256xf32>
    %33 = arith.select %24, %31, %32 : vector<16x256xi1>, vector<16x256xf32>
    %34 = arith.select %26, %32, %31 : vector<16x256xi1>, vector<16x256xf32>
    %c240_i32_8 = arith.constant 240 : i32
    %35 = tpu.dynamic_rotate %33 by %c240_i32_8 dim 1 : vector<16x256xf32>, i32 -> vector<16x256xf32>
    %c16_i32_9 = arith.constant 16 : i32
    %36 = tpu.dynamic_rotate %33 by %c16_i32_9 dim 1 : vector<16x256xf32>, i32 -> vector<16x256xf32>
    %37 = arith.select %28, %35, %36 : vector<16x256xi1>, vector<16x256xf32>
    %38 = arith.truncf %37 : vector<16x256xf32> to vector<16x256xbf16>
    %39 = arith.truncf %33 : vector<16x256xf32> to vector<16x256xbf16>
    %40 = arith.select %30, %36, %35 : vector<16x256xi1>, vector<16x256xf32>
    %41 = arith.truncf %40 : vector<16x256xf32> to vector<16x256xbf16>
    %c240_i32_10 = arith.constant 240 : i32
    %42 = tpu.dynamic_rotate %1 by %c240_i32_10 dim 1 : vector<16x256xf32>, i32 -> vector<16x256xf32>
    %c16_i32_11 = arith.constant 16 : i32
    %43 = tpu.dynamic_rotate %1 by %c16_i32_11 dim 1 : vector<16x256xf32>, i32 -> vector<16x256xf32>
    %44 = arith.select %28, %42, %43 : vector<16x256xi1>, vector<16x256xf32>
    %45 = arith.truncf %44 : vector<16x256xf32> to vector<16x256xbf16>
    %46 = arith.truncf %1 : vector<16x256xf32> to vector<16x256xbf16>
    %47 = arith.select %30, %43, %42 : vector<16x256xi1>, vector<16x256xf32>
    %48 = arith.truncf %47 : vector<16x256xf32> to vector<16x256xbf16>
    %c240_i32_12 = arith.constant 240 : i32
    %49 = tpu.dynamic_rotate %34 by %c240_i32_12 dim 1 : vector<16x256xf32>, i32 -> vector<16x256xf32>
    %c16_i32_13 = arith.constant 16 : i32
    %50 = tpu.dynamic_rotate %34 by %c16_i32_13 dim 1 : vector<16x256xf32>, i32 -> vector<16x256xf32>
    %51 = arith.select %28, %49, %50 : vector<16x256xi1>, vector<16x256xf32>
    %52 = arith.truncf %51 : vector<16x256xf32> to vector<16x256xbf16>
    %53 = arith.truncf %34 : vector<16x256xf32> to vector<16x256xbf16>
    %54 = arith.select %30, %50, %49 : vector<16x256xi1>, vector<16x256xf32>
    %55 = arith.truncf %54 : vector<16x256xf32> to vector<16x256xbf16>
    %56 = tpu.concatenate %38, %45, %52, %39, %46, %53, %41, %48, %55 in 0 : vector<16x256xbf16>, vector<16x256xbf16>, vector<16x256xbf16>, vector<16x256xbf16>, vector<16x256xbf16>, vector<16x256xbf16>, vector<16x256xbf16>, vector<16x256xbf16>, vector<16x256xbf16> -> vector<144x256xbf16>
    %c0_14 = arith.constant 0 : index
    %c0_15 = arith.constant 0 : index
    %57 = vector.load %arg2[%c0_14, %c0_15] : memref<16x144xbf16, #tpu.memory_space<vmem>>, vector<16x144xbf16>
    %cst = arith.constant dense<0.000000e+00> : vector<16x256xf32>
    %58 = tpu.matmul %57, %56, %cst {dimension_numbers = #tpu.dot_dimension_numbers<[1], [0], [0], [1], [0, 0, 1, 1], [], []>} : vector<16x144xbf16>, vector<144x256xbf16>, vector<16x256xf32> -> vector<16x256xf32>
    %cst_16 = arith.constant dense<0.000000e+00> : vector<16xf32>
    %59 = vector.multi_reduction <add>, %58, %cst_16 [1] : vector<16x256xf32> to vector<16xf32>
    %60 = vector.shape_cast %59 : vector<16xf32> to vector<16x1xf32>
    %cst_17 = arith.constant 2.560000e+02 : f32
    %61 = vector.broadcast %cst_17 : f32 to vector<16x1xf32>
    %62 = arith.divf %60, %61 : vector<16x1xf32>
    %63 = vector.broadcast %62 : vector<16x1xf32> to vector<16x256xf32>
    %64 = arith.subf %58, %63 : vector<16x256xf32>
    %65 = arith.mulf %64, %64 : vector<16x256xf32>
    %cst_18 = arith.constant dense<0.000000e+00> : vector<16xf32>
    %66 = vector.multi_reduction <add>, %65, %cst_18 [1] : vector<16x256xf32> to vector<16xf32>
    %67 = vector.shape_cast %66 : vector<16xf32> to vector<16x1xf32>
    %cst_19 = arith.constant 2.560000e+02 : f32
    %68 = vector.broadcast %cst_19 : f32 to vector<16x1xf32>
    %69 = arith.divf %67, %68 : vector<16x1xf32>
    %cst_20 = arith.constant 9.99999974E-6 : f32
    %70 = vector.broadcast %cst_20 : f32 to vector<16x1xf32>
    %71 = arith.addf %69, %70 : vector<16x1xf32>
    %72 = math.rsqrt %71 : vector<16x1xf32>
    %73 = vector.broadcast %72 : vector<16x1xf32> to vector<16x256xf32>
    %74 = arith.mulf %64, %73 : vector<16x256xf32>
    %cst_21 = arith.constant 0.000000e+00 : f32
    %75 = vector.broadcast %cst_21 : f32 to vector<16x256xf32>
    %76 = arith.cmpf ogt, %74, %75 : vector<16x256xf32>
    %cst_22 = arith.constant 0.000000e+00 : f32
    %77 = vector.broadcast %cst_22 : f32 to vector<16x256xf32>
    %78 = arith.minimumf %74, %77 : vector<16x256xf32>
    %79 = math.exp %78 : vector<16x256xf32>
    %cst_23 = arith.constant 1.000000e+00 : f32
    %80 = vector.broadcast %cst_23 : f32 to vector<16x256xf32>
    %81 = arith.subf %79, %80 : vector<16x256xf32>
    %82 = arith.select %76, %74, %81 : vector<16x256xi1>, vector<16x256xf32>
    %c255_i32_24 = arith.constant 255 : i32
    %83 = tpu.dynamic_rotate %82 by %c255_i32_24 dim 1 : vector<16x256xf32>, i32 -> vector<16x256xf32>
    %c1_i32_25 = arith.constant 1 : i32
    %84 = tpu.dynamic_rotate %82 by %c1_i32_25 dim 1 : vector<16x256xf32>, i32 -> vector<16x256xf32>
    %85 = arith.select %24, %83, %84 : vector<16x256xi1>, vector<16x256xf32>
    %86 = arith.select %26, %84, %83 : vector<16x256xi1>, vector<16x256xf32>
    %c240_i32_26 = arith.constant 240 : i32
    %87 = tpu.dynamic_rotate %85 by %c240_i32_26 dim 1 : vector<16x256xf32>, i32 -> vector<16x256xf32>
    %c16_i32_27 = arith.constant 16 : i32
    %88 = tpu.dynamic_rotate %85 by %c16_i32_27 dim 1 : vector<16x256xf32>, i32 -> vector<16x256xf32>
    %89 = arith.select %28, %87, %88 : vector<16x256xi1>, vector<16x256xf32>
    %90 = arith.truncf %89 : vector<16x256xf32> to vector<16x256xbf16>
    %91 = arith.truncf %85 : vector<16x256xf32> to vector<16x256xbf16>
    %92 = arith.select %30, %88, %87 : vector<16x256xi1>, vector<16x256xf32>
    %93 = arith.truncf %92 : vector<16x256xf32> to vector<16x256xbf16>
    %c240_i32_28 = arith.constant 240 : i32
    %94 = tpu.dynamic_rotate %82 by %c240_i32_28 dim 1 : vector<16x256xf32>, i32 -> vector<16x256xf32>
    %c16_i32_29 = arith.constant 16 : i32
    %95 = tpu.dynamic_rotate %82 by %c16_i32_29 dim 1 : vector<16x256xf32>, i32 -> vector<16x256xf32>
    %96 = arith.select %28, %94, %95 : vector<16x256xi1>, vector<16x256xf32>
    %97 = arith.truncf %96 : vector<16x256xf32> to vector<16x256xbf16>
    %98 = arith.truncf %82 : vector<16x256xf32> to vector<16x256xbf16>
    %99 = arith.select %30, %95, %94 : vector<16x256xi1>, vector<16x256xf32>
    %100 = arith.truncf %99 : vector<16x256xf32> to vector<16x256xbf16>
    %c240_i32_30 = arith.constant 240 : i32
    %101 = tpu.dynamic_rotate %86 by %c240_i32_30 dim 1 : vector<16x256xf32>, i32 -> vector<16x256xf32>
    %c16_i32_31 = arith.constant 16 : i32
    %102 = tpu.dynamic_rotate %86 by %c16_i32_31 dim 1 : vector<16x256xf32>, i32 -> vector<16x256xf32>
    %103 = arith.select %28, %101, %102 : vector<16x256xi1>, vector<16x256xf32>
    %104 = arith.truncf %103 : vector<16x256xf32> to vector<16x256xbf16>
    %105 = arith.truncf %86 : vector<16x256xf32> to vector<16x256xbf16>
    %106 = arith.select %30, %102, %101 : vector<16x256xi1>, vector<16x256xf32>
    %107 = arith.truncf %106 : vector<16x256xf32> to vector<16x256xbf16>
    %108 = tpu.concatenate %90, %97, %104, %91, %98, %105, %93, %100, %107 in 0 : vector<16x256xbf16>, vector<16x256xbf16>, vector<16x256xbf16>, vector<16x256xbf16>, vector<16x256xbf16>, vector<16x256xbf16>, vector<16x256xbf16>, vector<16x256xbf16>, vector<16x256xbf16> -> vector<144x256xbf16>
    %c0_32 = arith.constant 0 : index
    %c0_33 = arith.constant 0 : index
    %109 = vector.load %arg3[%c0_32, %c0_33] : memref<16x144xbf16, #tpu.memory_space<vmem>>, vector<16x144xbf16>
    %cst_34 = arith.constant dense<0.000000e+00> : vector<16x256xf32>
    %110 = tpu.matmul %109, %108, %cst_34 {dimension_numbers = #tpu.dot_dimension_numbers<[1], [0], [0], [1], [0, 0, 1, 1], [], []>} : vector<16x144xbf16>, vector<144x256xbf16>, vector<16x256xf32> -> vector<16x256xf32>
    %cst_35 = arith.constant dense<0.000000e+00> : vector<16xf32>
    %111 = vector.multi_reduction <add>, %110, %cst_35 [1] : vector<16x256xf32> to vector<16xf32>
    %112 = vector.shape_cast %111 : vector<16xf32> to vector<16x1xf32>
    %cst_36 = arith.constant 2.560000e+02 : f32
    %113 = vector.broadcast %cst_36 : f32 to vector<16x1xf32>
    %114 = arith.divf %112, %113 : vector<16x1xf32>
    %115 = vector.broadcast %114 : vector<16x1xf32> to vector<16x256xf32>
    %116 = arith.subf %110, %115 : vector<16x256xf32>
    %117 = arith.mulf %116, %116 : vector<16x256xf32>
    %cst_37 = arith.constant dense<0.000000e+00> : vector<16xf32>
    %118 = vector.multi_reduction <add>, %117, %cst_37 [1] : vector<16x256xf32> to vector<16xf32>
    %119 = vector.shape_cast %118 : vector<16xf32> to vector<16x1xf32>
    %cst_38 = arith.constant 2.560000e+02 : f32
    %120 = vector.broadcast %cst_38 : f32 to vector<16x1xf32>
    %121 = arith.divf %119, %120 : vector<16x1xf32>
    %cst_39 = arith.constant 9.99999974E-6 : f32
    %122 = vector.broadcast %cst_39 : f32 to vector<16x1xf32>
    %123 = arith.addf %121, %122 : vector<16x1xf32>
    %124 = math.rsqrt %123 : vector<16x1xf32>
    %125 = vector.broadcast %124 : vector<16x1xf32> to vector<16x256xf32>
    %126 = arith.mulf %116, %125 : vector<16x256xf32>
    %127 = arith.addf %1, %126 : vector<16x256xf32>
    %c0_40 = arith.constant 0 : index
    %c0_41 = arith.constant 0 : index
    %c0_42 = arith.constant 0 : index
    %128 = vector.load %arg4[%c0_40, %c0_41, %c0_42] : memref<1x16x256xf32, #tpu.memory_space<vmem>>, vector<1x16x256xf32>
    %129 = vector.shape_cast %128 : vector<1x16x256xf32> to vector<16x256xf32>
    %130 = vector.shape_cast %127 : vector<16x256xf32> to vector<1x16x256xf32>
    tpu.vector_store %arg4[%c0_40, %c0_41, %c0_42], %130 {strides = array<i32>} : memref<1x16x256xf32, #tpu.memory_space<vmem>>, vector<1x16x256xf32>,
    return
  }
  func.func @transform_0(%arg0: i32) -> (i32, i32, i32) {
    %c0_i32 = arith.constant 0 : i32
    %c0_i32_0 = arith.constant 0 : i32
    %c0_i32_1 = arith.constant 0 : i32
    return %arg0, %c0_i32, %c0_i32_0 : i32, i32, i32
  }
  func.func @transform_1(%arg0: i32) -> (i32, i32) {
    %c0_i32 = arith.constant 0 : i32
    %c0_i32_0 = arith.constant 0 : i32
    %c0_i32_1 = arith.constant 0 : i32
    return %c0_i32, %c0_i32_0 : i32, i32
  }
  func.func @transform_2(%arg0: i32) -> (i32, i32) {
    %c0_i32 = arith.constant 0 : i32
    %c0_i32_0 = arith.constant 0 : i32
    %c0_i32_1 = arith.constant 0 : i32
    return %c0_i32, %c0_i32_0 : i32, i32
  }
  func.func @transform_3(%arg0: i32) -> (i32, i32, i32) {
    %c0_i32 = arith.constant 0 : i32
    %c0_i32_0 = arith.constant 0 : i32
    %c0_i32_1 = arith.constant 0 : i32
    return %arg0, %c0_i32, %c0_i32_0 : i32, i32, i32
  }
}

</mosaic_0001>

<bundles_post_ra>
// kernel: tpu_custom_call.1
= control target key start
LH: loop header
LB: loop body
LE: loop exit
PB: predicated region body
PF: predicated region fallthrough
CT: control target
= control target key end

     0   :  { %8 = vsyncpa [#allocation3], 0  ;;  %s2143_s0 = inlined_call_operand.hbm [shape: f32[2,16,256], index: 0, kind: input, shape index: {}]   ;;  %s2144_s1 = inlined_call_operand.hbm [shape: bf16[16,144], index: 1, kind: input, shape index: {}]   ;;  %s2145_s2 = inlined_call_operand.hbm [shape: bf16[16,144], index: 2, kind: input, shape index: {}]   ;;  %s2146_s3 = inlined_call_operand.hbm [shape: f32[2,16,256], index: 3, kind: output, shape index: {}]  }
   0x1   :  { %10 = vsyncpa [#allocation3 + $0x1], 0 }
   0x2   :  { %11 = vsyncpa [#allocation6], 0 }
   0x3   :  { %12 = vsyncpa [#allocation4], 0 }
   0x4   :  { %14 = vsyncpa [#allocation4 + $0x1], 0  ;;  %s1628_s12 = smov 0   ;;  %s1630_s13 = smov 0  }
   0x5   :  { %s1632_s14 = smov 0   ;;  %s1634_s15 = smov 0  }
   0x6 LB: > { %s1649_s16 = sadd.s32 4294967295, %s1594_s15   ;;  %s1127_s17 = sadd.s32 4294967294, %s1594_s15   ;;  %s1594_s15 = sphi %s1634_s15, %s2164_s15   ;;  %s1590_s14 = sphi %s1632_s14, %s2163_s14   ;;  %s1586_s13 = sphi %s1630_s13, %s2162_s13   ;;  %s1582_s12 = sphi %s1628_s12, %s2161_s12  }
   0x7   : > { %p40_p0 = scmp.ne.s32.totalorder %s1586_s13, %s1582_s12  ;;  %p41_p1 = scmp.eq.s32.totalorder %s1649_s16, 0 }
   0x8   : > { %p106_p2 = scmp.eq.s32.totalorder %s1649_s16, 1  ;;  %p112_p3 = scmp.eq.s32.totalorder %s1127_s17, 1 }
   0x9   : > { %p1658_p4 = por %p41_p1, %p40_p0  ;;  %p1128_p5 = scmp.ge.s32.totalorder %s1594_s15, 1 }
   0xa   : > { %p1663_p6 = por %p112_p3, %p40_p0  ;;  %p119_p7 = scmp.lt.s32.totalorder %s1594_s15, 3 }
   0xb   : > { %s130_s22 = sshll.u32 %s2144_s1, 4  ;;  %s1596_s24 = smov [#allocation5]   ;;  %s131_s22 = int_to_ptr.hbm [resolvable:$true] %s130_s22 }
   0xc   : > { %p1671_p8 = pnand %p1128_p5, %p119_p7  ;;  %s132_s25 = sshll.u32 %s1596_s24, 4  ;;  %s133_s25 = int_to_ptr.vmem [resolvable:$true] %s132_s25 }
   0xd   : > { %s144_s28 = sshll.u32 %s2145_s2, 4  ;;  %s1597_s29 = smov 128   ;;  %s145_s28 = int_to_ptr.hbm [resolvable:$true] %s144_s28 }
   0xe   : > { %p1187_p9 = pneg %p1671_p8  ;;  %s1598_s30 = smov 8  }
   0xf   : > { %s1599_s4 = smov [#allocation7]   ;;  %s1684_s6 = sadd.s32 1, %s1594_s15  }
  0x10   : > { %p1188_p10 = pnand %p1187_p9, %p41_p1  ;;  %s146_s5 = sshll.u32 %s1599_s4, 4  ;;  %s147_s5 = int_to_ptr.vmem [resolvable:$true] %s146_s5 }
  0x11   : > { %s27_s7 = sadd.s32 1, %s1590_s14  ;;  %s24_s8 = ssub.s32 %s1594_s15, %s1684_s6 }
  0x12   : > { %1190 = dma.hbm_to_vmem [thread:$0]  (!%p1188_p10), %s131_s22, 256, %s133_s25, [#allocation6], %s1597_s29, %s1597_s29, %s1598_s30  }
  0x13   : > { %1193 = dma.hbm_to_vmem [thread:$0]  (!%p1188_p10), %s145_s28, 256, %s147_s5, [#allocation6], %s1597_s29, %s1597_s29, %s1598_s30  }
  0x14   : > { %p34_p12 = scmp.ne.s32.totalorder %s1590_s14, %s1586_s13  ;;  %p25_p13 = scmp.eq.s32.totalorder %s24_s8, 0 }
  0x15   : > { %p35_p0 = scmp.eq.s32.totalorder %s1594_s15, 0  ;;  %p1204_p5 = scmp.lt.s32.totalorder %s1594_s15, 2 }
  0x16   : > { %p1694_p3 = por %p106_p2, %p34_p12  ;;  %s160_s11 = sand.u32 1, %s1590_s14  }
  0x17   : > { %s1700_s10 = scalar_select %p25_p13, %s1590_s14, %s27_s7  }
  0x18   : > { %p36_p7 = por %p35_p0, %p34_p12  ;;  %s1132_s17 = sshll.u32 %s160_s11, 5 }
  0x19   : > { %s1169_s20 = sshll.u32 %s1594_s15, 5  ;;  %s164_s25 = scalar_lea.vmem [#allocation2], %s1132_s17 }
  0x1a   : > { %s169_s24 = scalar_lea.hbm %s2143_s0, %s1169_s20  ;;  %s172_s26 = sshll.u32 %s164_s25, 4  ;;  %s173_s26 = int_to_ptr.vmem [resolvable:$true] %s172_s26 }
  0x1b   : > { %s170_s27 = sshll.u32 %s169_s24, 4  ;;  %p1707_p2 = pnand %p1204_p5, %p36_p7  ;;  %s171_s27 = int_to_ptr.hbm [resolvable:$true] %s170_s27 }
  0x1c   : > { %s161_s29 = scalar_lea.sflag [#allocation3], %s160_s11  ;;  %s1494_s30 = sshra.s32 %s171_s27, 4  ;;  %s1495_s30 = int_to_ptr.hbm [resolvable:$true] %s1494_s30 }
  0x1d   : > { %s1496_s4 = scalar_lea.hbm %s1495_s30, 32  ;;  %p1498_p10 = pneg %p1707_p2 }
  0x1e   : > { %p1497_p9 = scmp.ne.s32.totalorder %s1495_s30, %s1496_s4  ;;  %s1501_s8 = scalar_lea.hbm %s2143_s0, 64 }
  0x1f   : > { %p1502_p0 = scmp.lt.s32.totalorder %s1495_s30, %s2143_s0  ;;  %p1503_p5 = scmp.lt.s32.totalorder %s1501_s8, %s1496_s4 }
  0x20   : > { %p1499_p12 = pnand %p1498_p10, %p1497_p9 }
  0x21   : > { %p1504_p7 = por %p1503_p5, %p1502_p0 }
  0x22   : > { %p1500_p13 = pneg %p1499_p12 }
  0x24   : > { %p1505_p11 = pnand %p1504_p7, %p1500_p13 }
  0x26   : > { %1508 = shalt.err (!%p1505_p11)
}
  0x27   : > { %s1600_s11 = smov 256   ;;  %s1601_s21 = smov 16  }
  0x28   : > { %1197 = dma.hbm_to_vmem [thread:$0]  (!%p1707_p2), %s171_s27, 512, %s173_s26, %s161_s29, %s1600_s11, %s1600_s11, %s1601_s21  }
  0x29   : > { %184 = sbr.rel (%p1671_p8) target bundleno = 1497 (0x5d9), region = 32  ;;  %s1724_s22 = sand.u32 (!%p1671_p8), 1, %s1586_s13  }
  0x2a   : > { %s1136_s24 = sshll.u32 (!%p1671_p8), %s1724_s22, 5  ;;  %s187_s25 = scalar_lea.sflag (!%p1671_p8), [#allocation3], %s1724_s22 }
  0x2b   : > { %s1730_s30 = scalar_lea.vmem (!%p1671_p8), [#allocation2], %s1136_s24 }
  0x2e   : > { %1569 = dma.done.wait (%p1658_p4), %s187_s25, 512  }
  0x2f   : > { %1571 = vsyncadd (%p1658_p4), %s187_s25, 4294966784 }
  0x30   : > { %1573 = dma.done.wait (%p41_p1), [#allocation6], 512  }
  0x31   : > { %1575 = vsyncadd (%p41_p1), [#allocation6], 4294966784  ;;  %v1741_v0 = vld [vmem:[%s1730_s30] sm:$0xff]  ;;  %v1744_v1 = vld [vmem:[%s1730_s30 + $0x10] sm:$0xff]  ;;  %s1602_s23 = smov 1   ;;  %s1603_s18 = smov 127   ;;  %v229_v6 = vlaneseq }
  0x32   : > { %v1262_v2 = vpack.i.bf16 %v1744_v1, %v1741_v0  ;;  %v1751_v3 = vld [vmem:[%s1730_s30 + $0x8] sm:$0xff]  ;;  %v1754_v4 = vld [vmem:[%s1730_s30 + $0x18] sm:$0xff]  ;;  %s1604_s26 = smov 112   ;;  %s1605_s27 = smov 16   ;;  %vm514_vm9 = vcmask 130048  }
  0x33   : > { %v1267_v5 = vpack.i.bf16 %v1754_v4, %v1751_v3  ;;  %v1764_v7 = vand.u32 127, %v229_v6  ;;  %s1174_s28 = sshll.u32 %s1649_s16, 5  ;;  %s223_s29 = scalar_lea.vmem [#allocation8], %s1136_s24 }
  0x34   : > { %1263 = vrot.lane.b32.xlu1 %v1262_v2, %s1602_s23  ;;  %1253 = vrot.lane.b32.xlu0 %v1262_v2, %s1603_s18  ;;  %s1031_s7 = scalar_lea.hbm %s2146_s3, %s1174_s28  ;;  %s1032_s8 = sshll.u32 %s223_s29, 4  ;;  %s1033_s8 = int_to_ptr.vmem [resolvable:$true] %s1032_s8 }
  0x35   : > { %1273 = vrot.lane.b32.xlu2 %v1262_v2, %s1604_s26  ;;  %v1767_v10 = vadd.s32 128, %v1764_v7  ;;  %v236_v12 = vand.u32 15, %v1764_v7  ;;  %vm285_vm0 = vcmp.lt.s32.totalorder %v1764_v7, 1  ;;  %vm272_vm1 = vcmp.lt.s32.totalorder %v1764_v7, 127  ;;  %s1034_s16 = sshll.u32 %s1031_s7, 4  ;;  %s1020_s17 = scalar_lea.sflag [#allocation4], %s1724_s22  ;;  %s1035_s16 = int_to_ptr.hbm [resolvable:$true] %s1034_s16 }
  0x36   : > { %vm260_vm6 = vcmp.lt.s32.totalorder %v1764_v7, 16  ;;  %vm306_vm7 = vcmp.lt.s32.totalorder %v1764_v7, 112  ;;  %s1538_s20 = sshra.s32 %s1035_s16, 4  ;;  %s1544_s25 = scalar_lea.hbm %s2146_s3, 64  ;;  %s1539_s20 = int_to_ptr.hbm [resolvable:$true] %s1538_s20 }
  0x37   : > { %v243_v11 = vand.u32 15, %v1767_v10  ;;  %vm1777_vm3 = vcmp.eq.s32.totalorder %v236_v12, 0  ;;  %vm1781_vm4 = vcmp.eq.s32.totalorder %v236_v12, 15  ;;  %vm263_vm8 = vcmp.ge.s32.totalorder %v1767_v10, 240  ;;  %s1540_s11 = scalar_lea.hbm %s1539_s20, 32  ;;  %p1545_p11 = scmp.lt.s32.totalorder %s1539_s20, %s2146_s3 }
  0x38   : > { %p1541_p1 = scmp.ne.s32.totalorder %s1539_s20, %s1540_s11  ;;  %p1546_p2 = scmp.lt.s32.totalorder %s1544_s25, %s1540_s11 }
  0x39   : > { %vm1773_vm2 = vcmp.eq.s32.totalorder %v243_v11, 0  ;;  %vm1785_vm5 = vcmp.eq.s32.totalorder %v243_v11, 15 }
  0x3a   : > { %p1542_p4 = pnand %p1541_p1, %p1694_p3  ;;  %p1547_p9 = por %p1546_p2, %p1545_p11 }
  0x3c   : > { %1268 = vrot.lane.b32.xlu1 %v1267_v5, %s1602_s23  ;;  %1258 = vrot.lane.b32.xlu0 %v1267_v5, %s1603_s18  ;;  %p1543_p8 = pneg %p1542_p4 }
  0x3d   : > { %1278 = vrot.lane.b32.xlu2 %v1267_v5, %s1604_s26 }
  0x3e   : > { %p1548_p10 = pnand %p1547_p9, %p1543_p8 }
  0x44   : > { %1288 = vrot.lane.b32.xlu1 %v1267_v5, %s1605_s27  ;;  %1283 = vrot.lane.b32.xlu0 %v1262_v2, %s1605_s27 }
  0xa6   : > { %v1264_v8 = vpop.permute.xlu1 %1263  ;;  %v1254_v9 = vpop.permute.xlu0 %1253 }
  0xa7   : > { %v1266_v13 = vunpack.i.h.bf16 %v1264_v8  ;;  %v1265_v14 = vunpack.i.l.bf16 %v1264_v8  ;;  %v1256_v23 = vunpack.i.h.bf16 %v1254_v9  ;;  %v1255_v24 = vunpack.i.l.bf16 %v1254_v9 }
  0xae   : > { %v1269_v15 = vpop.permute.xlu1 %1268  ;;  %v1259_v16 = vpop.permute.xlu0 %1258 }
  0xaf   : > { %v1271_v19 = vunpack.i.h.bf16 %v1269_v15  ;;  %v1270_v20 = vunpack.i.l.bf16 %v1269_v15  ;;  %v1261_v21 = vunpack.i.h.bf16 %v1259_v16  ;;  %v1260_v22 = vunpack.i.l.bf16 %v1259_v16 }
  0xb1   : > { %v286_v27 = vsel %vm285_vm0, %v1265_v14, %v1270_v20  ;;  %v287_v28 = vsel %vm285_vm0, %v1266_v13, %v1271_v19  ;;  %v288_v29 = vsel %vm285_vm0, %v1270_v20, %v1265_v14  ;;  %v289_v30 = vsel %vm285_vm0, %v1271_v19, %v1266_v13  ;;  %v1274_v13 = vpop.permute.xlu2 %1273 }
  0xb2   : > { %v273_v31 = vsel %vm272_vm1, %v1255_v24, %v1260_v22  ;;  %v274_v32 = vsel %vm272_vm1, %v1256_v23, %v1261_v21  ;;  %v275_v33 = vsel %vm272_vm1, %v1260_v22, %v1255_v24  ;;  %v276_v34 = vsel %vm272_vm1, %v1261_v21, %v1256_v23 }
  0xb3   : > { %v291_v35 = vsel %vm1773_vm2, %v275_v33, %v286_v27  ;;  %v293_v36 = vsel %vm1773_vm2, %v276_v34, %v287_v28  ;;  %v290_v37 = vsel %vm1777_vm3, %v273_v31, %v288_v29  ;;  %v292_v38 = vsel %vm1777_vm3, %v274_v32, %v289_v30 }
  0xb4   : > { %v1297_v39 = vpack.i.bf16 %v293_v36, %v291_v35  ;;  %v1302_v40 = vpack.i.bf16 %v292_v38, %v290_v37  ;;  %v294_v41 = vsel %vm1781_vm4, %v288_v29, %v273_v31  ;;  %v296_v42 = vsel %vm1781_vm4, %v289_v30, %v274_v32 }
  0xb5   : > { %v295_v43 = vsel %vm1785_vm5, %v286_v27, %v275_v33  ;;  %v297_v44 = vsel %vm1785_vm5, %v287_v28, %v276_v34  ;;  %v329_v47 = vpack.c.bf16 %v291_v35, %v290_v37  ;;  %v330_v48 = vpack.c.bf16 %v293_v36, %v292_v38 }
  0xb6   : > { %1298 = vrot.lane.b32.xlu0 %v1297_v39, %s1604_s26  ;;  %1303 = vrot.lane.b32.xlu1 %v1302_v40, %s1605_s27  ;;  %v405_v45 = vpack.c.bf16 %v295_v43, %v294_v41  ;;  %v406_v46 = vpack.c.bf16 %v297_v44, %v296_v42  ;;  %v1312_v59 = vpack.i.bf16 %v296_v42, %v294_v41  ;;  %v1289_v63 = vpop.permute.xlu1 %1288  ;;  %v1284_v2 = vpop.permute.xlu0 %1283  ;;  %v1276_v15 = vunpack.i.h.bf16 %v1274_v13 }
  0xb7   : > { %1293 = vrot.lane.b32.xlu2 %v1302_v40, %s1604_s26  ;;  %v445_v53 = vunpack.c.l.b16 %v329_v47  ;;  %v447_v54 = vunpack.c.l.b16 %v330_v48  ;;  %v446_v55 = vunpack.c.h.b16 %v329_v47  ;;  %v448_v56 = vunpack.c.h.b16 %v330_v48 }
  0xb8   : > { %v465_v49 = vunpack.c.l.b16 %v405_v45  ;;  %v467_v50 = vunpack.c.l.b16 %v406_v46  ;;  %v466_v51 = vunpack.c.h.b16 %v405_v45  ;;  %v468_v52 = vunpack.c.h.b16 %v406_v46 }
  0xb9   : > { %v1317_v60 = vpack.i.bf16 %v297_v44, %v295_v43  ;;  %v1828_v61 = vpack.c.b16 %v447_v54, %v445_v53  ;;  %v1830_v62 = vpack.c.b16 %v448_v56, %v446_v55  ;;  %v1291_v5 = vunpack.i.h.bf16 %v1289_v63  ;;  %v1279_v14 = vpop.permute.xlu2 %1278 }
  0xba   : > { %v1824_v57 = vpack.c.b16 %v467_v50, %v465_v49  ;;  %v1826_v58 = vpack.c.b16 %v468_v52, %v466_v51  ;;  %v1290_v6 = vunpack.i.l.bf16 %v1289_v63  ;;  %v1286_v8 = vunpack.i.h.bf16 %v1284_v2 }
  0xbb   : > { %v1285_v9 = vunpack.i.l.bf16 %v1284_v2  ;;  %v1275_v16 = vunpack.i.l.bf16 %v1274_v13  ;;  %v1281_v19 = vunpack.i.h.bf16 %v1279_v14  ;;  %v1280_v20 = vunpack.i.l.bf16 %v1279_v14 }
  0xbc   : > { %v360_v11 = vsel %vm260_vm6, %v1291_v5, %v1286_v8  ;;  %v358_v23 = vsel %vm260_vm6, %v1286_v8, %v1291_v5 }
  0xbd   : > { %v359_v12 = vsel %vm260_vm6, %v1290_v6, %v1285_v9  ;;  %v347_v21 = vsel %vm306_vm7, %v1280_v20, %v1275_v16  ;;  %v348_v22 = vsel %vm306_vm7, %v1281_v19, %v1276_v15  ;;  %v357_v24 = vsel %vm260_vm6, %v1285_v9, %v1290_v6 }
  0xbe   : > { %1313 = vrot.lane.b32.xlu0 %v1312_v59, %s1604_s26  ;;  %1318 = vrot.lane.b32.xlu1 %v1317_v60, %s1604_s26  ;;  %v345_v27 = vsel %vm306_vm7, %v1275_v16, %v1280_v20  ;;  %v346_v28 = vsel %vm306_vm7, %v1276_v15, %v1281_v19  ;;  %v370_v29 = vsel %vm263_vm8, %v357_v24, %v347_v21 }
  0xbf   : > { %1308 = vrot.lane.b32.xlu2 %v1297_v39, %s1605_s27  ;;  %v372_v30 = vsel %vm263_vm8, %v358_v23, %v348_v22  ;;  %v373_v31 = vpack.c.bf16 %v370_v29, %v345_v27  ;;  %v361_v33 = vsel %vm260_vm6, %v345_v27, %v359_v12  ;;  %v363_v34 = vsel %vm260_vm6, %v346_v28, %v360_v11 }
  0xc0   : > { %v374_v32 = vpack.c.bf16 %v372_v30, %v346_v28  ;;  %v365_v39 = vpack.c.bf16 %v357_v24, %v361_v33  ;;  %v366_v40 = vpack.c.bf16 %v358_v23, %v363_v34  ;;  %v367_v19 = vpack.c.bf16 %v1751_v3, %v1741_v0 }
  0xc1   : > { %v485_v35 = vunpack.c.l.b16 %v373_v31  ;;  %v486_v37 = vunpack.c.h.b16 %v373_v31  ;;  %v368_v20 = vpack.c.bf16 %v1754_v4, %v1744_v1 }
  0xc2   : > { %v487_v36 = vunpack.c.l.b16 %v374_v32  ;;  %v488_v38 = vunpack.c.h.b16 %v374_v32  ;;  %v425_v43 = vunpack.c.l.b16 %v365_v39  ;;  %v427_v44 = vunpack.c.l.b16 %v366_v40 }
  0xc3   : > { %v426_v45 = vunpack.c.h.b16 %v365_v39  ;;  %v428_v46 = vunpack.c.h.b16 %v366_v40  ;;  %v455_v31 = vunpack.c.l.b16 %v367_v19  ;;  %v457_v32 = vunpack.c.l.b16 %v368_v20 }
  0xc4   : > { %v489_v41 = vpack.c.b16 %v487_v36, %v485_v35  ;;  %v490_v42 = vpack.c.b16 %v488_v38, %v486_v37  ;;  %v1864_v47 = vpack.c.b16 %v427_v44, %v425_v43  ;;  %v456_v33 = vunpack.c.h.b16 %v367_v19 }
  0xc5   : > { %v1866_v48 = vpack.c.b16 %v428_v46, %v426_v45  ;;  %v458_v34 = vunpack.c.h.b16 %v368_v20  ;;  %v459_v39 = vpack.c.b16 %v457_v32, %v455_v31 }
  0xc6   : > { %1328 = vrot.lane.b32.xlu0 %v1317_v60, %s1605_s27  ;;  %518 = vmatpush.bf16.msra.mxu0 %v489_v41 }
  0xc7   : > { %1323 = vrot.lane.b32.xlu2 %v1312_v59, %s1605_s27  ;;  %546 = vmatpush.bf16.msra.mxu2 %v490_v42  ;;  %v460_v40 = vpack.c.b16 %v458_v34, %v456_v33  ;;  %v1171_v33 = vld [vmem:[#allocation5 + $0x4] sm:$0xf0] }
 0x111   : > { %v1294_v49 = vpop.permute.xlu2 %1293 }
 0x112   : > { %v1296_v51 = vunpack.i.h.bf16 %v1294_v49  ;;  %v1295_v52 = vunpack.i.l.bf16 %v1294_v49 }
 0x119   : > { %v1309_v50 = vpop.permute.xlu2 %1308 }
 0x11a   : > { %v1311_v63 = vunpack.i.h.bf16 %v1309_v50  ;;  %v1310_v2 = vunpack.i.l.bf16 %v1309_v50 }
 0x121   : > { %v1324_v35 = vpop.permute.xlu2 %1323 }
 0x122   : > { %v1326_v1 = vunpack.i.h.bf16 %v1324_v35  ;;  %v1325_v4 = vunpack.i.l.bf16 %v1324_v35 }
 0x128   : > { %v1299_v53 = vpop.permute.xlu0 %1298  ;;  %v1304_v54 = vpop.permute.xlu1 %1303 }
 0x129   : > { %v1301_v55 = vunpack.i.h.bf16 %v1299_v53  ;;  %v1300_v56 = vunpack.i.l.bf16 %v1299_v53  ;;  %v1306_v59 = vunpack.i.h.bf16 %v1304_v54  ;;  %v1305_v60 = vunpack.i.l.bf16 %v1304_v54 }
 0x12b   : > { %v307_v5 = vsel %vm306_vm7, %v1295_v52, %v1300_v56  ;;  %v308_v6 = vsel %vm306_vm7, %v1296_v51, %v1301_v55  ;;  %v309_v8 = vsel %vm306_vm7, %v1300_v56, %v1295_v52  ;;  %v310_v9 = vsel %vm306_vm7, %v1301_v55, %v1296_v51 }
 0x12c   : > { %v1878_v11 = vsel %vm260_vm6, %v1305_v60, %v1310_v2  ;;  %v1882_v12 = vsel %vm260_vm6, %v1306_v59, %v1311_v63  ;;  %v321_v41 = vsel %vm260_vm6, %v1310_v2, %v1305_v60  ;;  %v322_v42 = vsel %vm260_vm6, %v1311_v63, %v1306_v59 }
 0x12d   : > { %v332_v13 = vsel %vm263_vm8, %v1878_v11, %v309_v8  ;;  %v334_v14 = vsel %vm263_vm8, %v1882_v12, %v310_v9  ;;  %v323_v8 = vsel %vm260_vm6, %v307_v5, %v321_v41  ;;  %v325_v9 = vsel %vm260_vm6, %v308_v6, %v322_v42 }
 0x12e   : > { %v335_v15 = vpack.c.bf16 %v332_v13, %v307_v5  ;;  %v336_v16 = vpack.c.bf16 %v334_v14, %v308_v6  ;;  %v327_v5 = vpack.c.bf16 %v1878_v11, %v323_v8  ;;  %v1142_v11 = vld [vmem:[#allocation5] sm:$0xf] }
 0x130   : > { %v1314_v21 = vpop.permute.xlu0 %1313  ;;  %v475_v22 = vunpack.c.l.b16 %v335_v15  ;;  %v477_v23 = vunpack.c.l.b16 %v336_v16  ;;  %v476_v24 = vunpack.c.h.b16 %v335_v15  ;;  %v478_v27 = vunpack.c.h.b16 %v336_v16  ;;  %v1319_v30 = vpop.permute.xlu1 %1318 }
 0x131   : > { %v1316_v36 = vunpack.i.h.bf16 %v1314_v21  ;;  %v1315_v0 = vunpack.i.l.bf16 %v1314_v21  ;;  %v1321_v3 = vunpack.i.h.bf16 %v1319_v30  ;;  %v1320_v37 = vunpack.i.l.bf16 %v1319_v30  ;;  %v1170_v21 = vld [vmem:[#allocation5 + $0x4] sm:$0xf] }
 0x132   : > { %v479_v28 = vpack.c.b16 %v477_v23, %v475_v22  ;;  %v480_v29 = vpack.c.b16 %v478_v27, %v476_v24  ;;  %v1144_v22 = vld [vmem:[#allocation5 + $0x8] sm:$0xf0]  ;;  %v416_v30 = vunpack.c.h.b16 %v327_v5 }
 0x133   : > { %v384_v45 = vsel %vm306_vm7, %v1316_v36, %v1321_v3  ;;  %v386_v46 = vsel %vm306_vm7, %v1321_v3, %v1316_v36  ;;  %v1147_v6 = vor.u32 %v1170_v21, %v1144_v22  ;;  %v1143_v36 = vor.u32 %v1171_v33, %v1142_v11 }
 0x134   : > { %519 = vmatpush.bf16.msra.mxu0 %v479_v28  ;;  %547 = vmatpush.bf16.msra.mxu2 %v480_v29  ;;  %v328_v28 = vpack.c.bf16 %v1882_v12, %v325_v9  ;;  %v415_v29 = vunpack.c.l.b16 %v327_v5 }
 0x138   : > { %520 = vmatpush.bf16.msra.mxu0 %v1824_v57  ;;  %548 = vmatpush.bf16.msra.mxu2 %v1826_v58  ;;  %v1329_v38 = vpop.permute.xlu0 %1328  ;;  %v383_v57 = vsel %vm306_vm7, %v1315_v0, %v1320_v37  ;;  %v385_v58 = vsel %vm306_vm7, %v1320_v37, %v1315_v0 }
 0x139   : > { %v1331_v43 = vunpack.i.h.bf16 %v1329_v38  ;;  %v1330_v44 = vunpack.i.l.bf16 %v1329_v38 }
 0x13b   : > { %v395_v49 = vsel %vm260_vm6, %v1325_v4, %v1330_v44  ;;  %v396_v50 = vsel %vm260_vm6, %v1326_v1, %v1331_v43  ;;  %v397_v51 = vsel %vm260_vm6, %v1330_v44, %v1325_v4  ;;  %v398_v52 = vsel %vm260_vm6, %v1331_v43, %v1326_v1 }
 0x13c   : > { %521 = vmatpush.bf16.msra.mxu0 %v459_v39  ;;  %549 = vmatpush.bf16.msra.mxu2 %v460_v40  ;;  %v399_v53 = vsel %vm260_vm6, %v383_v57, %v397_v51  ;;  %v401_v54 = vsel %vm260_vm6, %v384_v45, %v398_v52  ;;  %v408_v55 = vsel %vm263_vm8, %v395_v49, %v385_v58 }
 0x13d   : > { %v403_v56 = vpack.c.bf16 %v395_v49, %v399_v53  ;;  %v404_v59 = vpack.c.bf16 %v396_v50, %v401_v54  ;;  %v410_v60 = vsel %vm263_vm8, %v396_v50, %v386_v46  ;;  %v411_v63 = vpack.c.bf16 %v408_v55, %v383_v57 }
 0x13e   : > { %v412_v2 = vpack.c.bf16 %v410_v60, %v384_v45  ;;  %v1606_v45 = vmov 256.0  }
 0x13f   : > { %v435_v13 = vunpack.c.l.b16 %v403_v56  ;;  %v437_v14 = vunpack.c.l.b16 %v404_v59  ;;  %v495_v15 = vunpack.c.l.b16 %v411_v63  ;;  %v436_v16 = vunpack.c.h.b16 %v403_v56 }
 0x140   : > { %522 = vmatpush.bf16.msra.mxu0 %v1828_v61  ;;  %550 = vmatpush.bf16.msra.mxu2 %v1830_v62  ;;  %v497_v19 = vunpack.c.l.b16 %v412_v2  ;;  %v438_v20 = vunpack.c.h.b16 %v404_v59  ;;  %v417_v61 = vunpack.c.l.b16 %v328_v28  ;;  %v418_v62 = vunpack.c.h.b16 %v328_v28 }
 0x141   : > { %v439_v23 = vpack.c.b16 %v437_v14, %v435_v13  ;;  %v496_v31 = vunpack.c.h.b16 %v411_v63  ;;  %v498_v32 = vunpack.c.h.b16 %v412_v2  ;;  %1412 = vrcp.f32 %v1606_v45 }
 0x142   : > { %v499_v24 = vpack.c.b16 %v497_v19, %v495_v15  ;;  %v440_v27 = vpack.c.b16 %v438_v20, %v436_v16  ;;  %v419_v12 = vpack.c.b16 %v417_v61, %v415_v29  ;;  %v420_v34 = vpack.c.b16 %v418_v62, %v416_v30 }
 0x143   : > { %v500_v35 = vpack.c.b16 %v498_v32, %v496_v31 }
 0x144   : > { %523 = vmatpush.bf16.msra.mxu0 %v439_v23  ;;  %539 = vmatpush.bf16.msra.mxu1 %v499_v24 }
 0x145   : > { %551 = vmatpush.bf16.msra.mxu2 %v440_v27 }
 0x147   : > { %1148 = vmatmul.msk.bf16.vlgmr.msra.gmra.mxu1 %vm514_vm9, %v1147_v6  ;;  %v1413_v46 = vpop.eup %1412 }
 0x148   : > { %524 = vmatpush.bf16.msra.mxu0 %v1864_v47  ;;  %v581_v57 = vmul.f32 256.0, %v1413_v46  ;;  %vm585_vm10 = vweird.f32 %v1413_v46 }
 0x149   : > { %552 = vmatpush.bf16.msra.mxu2 %v1866_v48 }
 0x14a   : > { %v582_v58 = vsub.f32 1.0, %v581_v57 }
 0x14c   : > { %525 = vmatpush.bf16.msra.mxu0 %v419_v12  ;;  %v583_v49 = vmul.f32 %v1413_v46, %v582_v58 }
 0x14d   : > { %553 = vmatpush.bf16.msra.mxu2 %v420_v34 }
 0x14e   : > { %v584_v50 = vadd.f32 %v1413_v46, %v583_v49 }
 0x14f   : > { %526 = vmatmul.bf16.vlgmr.msra.gmra.mxu0 %v1143_v36 }
 0x150   : > { %554 = vmatmul.bf16.vlgmr.msra.gmra.mxu2 %v1143_v36  ;;  %v1936_v51 = vsel %vm585_vm10, %v1413_v46, %v584_v50 }
 0x151   : > { %567 = vmatpush.bf16.msrb.mxu2 %v500_v35 }
 0x160   : > { %1149 = vmatmul.msk.bf16.vlgmr.msrb.gmra.mxu2 %vm514_vm9, %v1147_v6 }
 0x1c4   : > { %v541_v37 = vpop.f32.mrf.mxu1 }
 0x1cc   : > { %v527_v47 = vpop.f32.mrf.mxu0  ;;  %v543_v40 = vpop.f32.mrf.mxu1 }
 0x1cd   : > { %v542_v1 = vadd.f32 %v541_v37, %v527_v47 }
 0x1d3   : > { %v555_v0 = vpop.f32.mrf.mxu2 }
 0x1d4   : > { %v529_v39 = vpop.f32.mrf.mxu0 }
 0x1d5   : > { %v544_v42 = vadd.f32 %v543_v40, %v529_v39 }
 0x1db   : > { %v557_v3 = vpop.f32.mrf.mxu2 }
 0x1e3   : > { %v569_v4 = vpop.f32.mrf.mxu2 }
 0x1e4   : > { %v570_v48 = vadd.f32 %v569_v4, %v555_v0 }
 0x1e6   : > { %v574_v38 = vadd.f32 %v570_v48, %v542_v1 }
 0x1e8   : > { %575 = vadd.xlane.f32.xlu1 %v574_v38 }
 0x1eb   : > { %v571_v41 = vpop.f32.mrf.mxu2 }
 0x1ec   : > { %v572_v43 = vadd.f32 %v571_v41, %v557_v3 }
 0x1ee   : > { %v577_v44 = vadd.f32 %v572_v43, %v544_v42 }
 0x1f0   : > { %578 = vadd.xlane.f32.xlu2 %v577_v44 }
 0x25b   : > { %v576_v52 = vpop.xlane.xlu1 %575 }
 0x25c   : > { %v587_v53 = vmul.f32 %v1936_v51, %v576_v52 }
 0x25e   : > { %v589_v54 = vsub.f32 %v542_v1, %v587_v53  ;;  %v590_v55 = vsub.f32 %v570_v48, %v587_v53 }
 0x260   : > { %v593_v56 = vmul.f32 %v589_v54, %v589_v54  ;;  %v594_v59 = vmul.f32 %v590_v55, %v590_v55 }
 0x262   : > { %v597_v60 = vadd.f32 %v594_v59, %v593_v56 }
 0x263   : > { %v579_v63 = vpop.xlane.xlu2 %578 }
 0x264   : > { %v588_v2 = vmul.f32 %v1936_v51, %v579_v63  ;;  %598 = vadd.xlane.f32.xlu0 %v597_v60 }
 0x266   : > { %v591_v8 = vsub.f32 %v544_v42, %v588_v2  ;;  %v592_v9 = vsub.f32 %v572_v43, %v588_v2 }
 0x268   : > { %v595_v13 = vmul.f32 %v591_v8, %v591_v8  ;;  %v596_v14 = vmul.f32 %v592_v9, %v592_v9 }
 0x26a   : > { %v600_v15 = vadd.f32 %v596_v14, %v595_v13 }
 0x26c   : > { %601 = vadd.xlane.f32.xlu2 %v600_v15 }
 0x2d7   : > { %v599_v16 = vpop.xlane.xlu0 %598 }
 0x2d8   : > { %v603_v19 = vmul.f32 %v599_v16, %v1936_v51 }
 0x2da   : > { %v605_v20 = vadd.f32 1e-05, %v603_v19 }
 0x2dc   : > { %1414 = vrsqrt.f32 %v605_v20  ;;  %vm613_vm12 = vweird.f32 %v605_v20 }
 0x2df   : > { %v602_v21 = vpop.xlane.xlu2 %601 }
 0x2e0   : > { %v604_v22 = vmul.f32 %v602_v21, %v1936_v51 }
 0x2e2   : > { %v1415_v23 = vpop.eup %1414  ;;  %v606_v24 = vadd.f32 1e-05, %v604_v22 }
 0x2e3   : > { %v608_v27 = vmul.f32 %v1415_v23, %v605_v20  ;;  %vm614_vm11 = vweird.f32 %v1415_v23 }
 0x2e4   : > { %1416 = vrsqrt.f32 %v606_v24  ;;  %vm615_vm13 = vmor %vm613_vm12, %vm614_vm11  ;;  %vm623_vm15 = vweird.f32 %v606_v24 }
 0x2e5   : > { %v609_v5 = vmul.f32 %v1415_v23, %v608_v27 }
 0x2e7   : > { %v610_v28 = vmul.f32 0.5, %v609_v5 }
 0x2e9   : > { %v611_v6 = vsub.f32 1.5, %v610_v28 }
 0x2ea   : > { %v1417_v29 = vpop.eup %1416 }
 0x2eb   : > { %v612_v61 = vmul.f32 %v1415_v23, %v611_v6  ;;  %v618_v30 = vmul.f32 %v1417_v29, %v606_v24  ;;  %vm624_vm14 = vweird.f32 %v1417_v29 }
 0x2ec   : > { %vm625_vm10 = vmor %vm623_vm15, %vm624_vm14 }
 0x2ed   : > { %v616_v62 = vsel %vm615_vm13, %v1415_v23, %v612_v61  ;;  %v619_v31 = vmul.f32 %v1417_v29, %v618_v30 }
 0x2ee   : > { %v627_v32 = vmul.f32 %v616_v62, %v589_v54  ;;  %v628_v11 = vmul.f32 %v616_v62, %v590_v55 }
 0x2ef   : > { %v620_v33 = vmul.f32 0.5, %v619_v31 }
 0x2f0   : > { %v635_v12 = vmin.f32 %v627_v32, 0.0  ;;  %v636_v34 = vmin.f32 %v628_v11, 0.0  ;;  %vm631_vm11 = vcmp.gt.f32.partialorder %v627_v32, 0.0  ;;  %vm632_vm12 = vcmp.gt.f32.partialorder %v628_v11, 0.0 }
 0x2f1   : > { %v621_v35 = vsub.f32 1.5, %v620_v33 }
 0x2f2   : > { %v639_v36 = vmul.f32 1.442695, %v635_v12  ;;  %v641_v0 = vmul.f32 1.442695, %v636_v34 }
 0x2f3   : > { %v622_v3 = vmul.f32 %v1417_v29, %v621_v35 }
 0x2f4   : > { %1418 = vpow2.f32 %v639_v36 }
 0x2f5   : > { %1420 = vpow2.f32 %v641_v0  ;;  %v626_v47 = vsel %vm625_vm10, %v1417_v29, %v622_v3 }
 0x2f6   : > { %v629_v37 = vmul.f32 %v626_v47, %v591_v8  ;;  %v630_v1 = vmul.f32 %v626_v47, %v592_v9 }
 0x2f8   : > { %v637_v4 = vmin.f32 %v629_v37, 0.0  ;;  %v638_v48 = vmin.f32 %v630_v1, 0.0  ;;  %vm633_vm13 = vcmp.gt.f32.partialorder %v629_v37, 0.0  ;;  %vm634_vm14 = vcmp.gt.f32.partialorder %v630_v1, 0.0 }
 0x2fa   : > { %v1419_v38 = vpop.eup %1418  ;;  %v643_v39 = vmul.f32 1.442695, %v637_v4  ;;  %v645_v40 = vmul.f32 1.442695, %v638_v48 }
 0x2fb   : > { %v1421_v41 = vpop.eup %1420  ;;  %v1150_v42 = vadd.f32 -1.0, %v1419_v38 }
 0x2fc   : > { %1422 = vpow2.f32 %v643_v39  ;;  %v1151_v43 = vadd.f32 -1.0, %v1421_v41 }
 0x2fd   : > { %1424 = vpow2.f32 %v645_v40  ;;  %v651_v44 = vsel %vm631_vm11, %v627_v32, %v1150_v42 }
 0x2fe   : > { %v652_v45 = vsel %vm632_vm12, %v628_v11, %v1151_v43 }
 0x2ff   : > { %v755_v46 = vpack.c.bf16 %v652_v45, %v651_v44 }
 0x301   : > { %v843_v59 = vunpack.c.l.b16 %v755_v46  ;;  %v844_v63 = vunpack.c.h.b16 %v755_v46 }
 0x302   : > { %v1423_v57 = vpop.eup %1422 }
 0x303   : > { %v1425_v58 = vpop.eup %1424  ;;  %v1152_v49 = vadd.f32 -1.0, %v1423_v57 }
 0x304   : > { %v1153_v50 = vadd.f32 -1.0, %v1425_v58 }
 0x305   : > { %v653_v52 = vsel %vm633_vm13, %v629_v37, %v1152_v49 }
 0x306   : > { %v654_v53 = vsel %vm634_vm14, %v630_v1, %v1153_v50  ;;  %v1342_v54 = vpack.i.bf16 %v653_v52, %v651_v44 }
 0x307   : > { %v1337_v55 = vpack.i.bf16 %v654_v53, %v652_v45  ;;  %v756_v56 = vpack.c.bf16 %v654_v53, %v653_v52 }
 0x308   : > { %1343 = vrot.lane.b32.xlu0 %v1342_v54, %s1602_s23  ;;  %1333 = vrot.lane.b32.xlu1 %v1342_v54, %s1603_s18 }
 0x309   : > { %1338 = vrot.lane.b32.xlu2 %v1337_v55, %s1603_s18  ;;  %v845_v60 = vunpack.c.l.b16 %v756_v56  ;;  %v846_v2 = vunpack.c.h.b16 %v756_v56 }
 0x30b   : > { %v1945_v8 = vpack.c.b16 %v845_v60, %v843_v59  ;;  %v1947_v9 = vpack.c.b16 %v846_v2, %v844_v63 }
 0x310   : > { %1353 = vrot.lane.b32.xlu0 %v1342_v54, %s1604_s26  ;;  %1348 = vrot.lane.b32.xlu1 %v1337_v55, %s1602_s23 }
 0x311   : > { %1358 = vrot.lane.b32.xlu2 %v1337_v55, %s1604_s26 }
 0x318   : > { %1368 = vrot.lane.b32.xlu0 %v1337_v55, %s1605_s27  ;;  %1363 = vrot.lane.b32.xlu1 %v1342_v54, %s1605_s27 }
 0x363   : > { %v1339_v13 = vpop.permute.xlu2 %1338 }
 0x364   : > { %v1341_v21 = vunpack.i.h.bf16 %v1339_v13  ;;  %v1340_v22 = vunpack.i.l.bf16 %v1339_v13 }
 0x36b   : > { %v1359_v16 = vpop.permute.xlu2 %1358 }
 0x36c   : > { %v1361_v23 = vunpack.i.h.bf16 %v1359_v16  ;;  %v1360_v24 = vunpack.i.l.bf16 %v1359_v16 }
 0x37a   : > { %v1344_v14 = vpop.permute.xlu0 %1343  ;;  %v1334_v15 = vpop.permute.xlu1 %1333 }
 0x37b   : > { %v1336_v19 = vunpack.i.h.bf16 %v1334_v15  ;;  %v1335_v20 = vunpack.i.l.bf16 %v1334_v15  ;;  %v1346_v28 = vunpack.i.h.bf16 %v1344_v14  ;;  %v1345_v30 = vunpack.i.l.bf16 %v1344_v14 }
 0x37d   : > { %v664_v62 = vsel %vm272_vm1, %v1336_v19, %v1341_v21  ;;  %v666_v31 = vsel %vm272_vm1, %v1341_v21, %v1336_v19  ;;  %v663_v32 = vsel %vm272_vm1, %v1335_v20, %v1340_v22  ;;  %v665_v11 = vsel %vm272_vm1, %v1340_v22, %v1335_v20 }
 0x382   : > { %v1354_v27 = vpop.permute.xlu0 %1353  ;;  %v1349_v5 = vpop.permute.xlu1 %1348 }
 0x383   : > { %v1356_v6 = vunpack.i.h.bf16 %v1354_v27  ;;  %v1351_v29 = vunpack.i.h.bf16 %v1349_v5  ;;  %v1350_v61 = vunpack.i.l.bf16 %v1349_v5  ;;  %v1355_v34 = vunpack.i.l.bf16 %v1354_v27 }
 0x385   : > { %v734_v33 = vsel %vm306_vm7, %v1356_v6, %v1361_v23  ;;  %v736_v12 = vsel %vm306_vm7, %v1361_v23, %v1356_v6  ;;  %v676_v35 = vsel %vm285_vm0, %v1346_v28, %v1351_v29  ;;  %v678_v36 = vsel %vm285_vm0, %v1351_v29, %v1346_v28 }
 0x386   : > { %v675_v0 = vsel %vm285_vm0, %v1345_v30, %v1350_v61  ;;  %v677_v3 = vsel %vm285_vm0, %v1350_v61, %v1345_v30  ;;  %v682_v37 = vsel %vm1773_vm2, %v666_v31, %v676_v35  ;;  %v681_v4 = vsel %vm1777_vm3, %v664_v62, %v678_v36 }
 0x387   : > { %v680_v47 = vsel %vm1773_vm2, %v665_v11, %v675_v0  ;;  %v679_v1 = vsel %vm1777_vm3, %v663_v32, %v677_v3  ;;  %v683_v39 = vsel %vm1781_vm4, %v677_v3, %v663_v32  ;;  %v733_v40 = vsel %vm306_vm7, %v1355_v34, %v1360_v24 }
 0x388   : > { %v1377_v48 = vpack.i.bf16 %v682_v37, %v680_v47  ;;  %v1382_v38 = vpack.i.bf16 %v681_v4, %v679_v1  ;;  %v685_v41 = vsel %vm1781_vm4, %v678_v36, %v664_v62  ;;  %v684_v17 = vsel %vm1785_vm5, %v675_v0, %v665_v11 }
 0x389   : > { %v686_v42 = vsel %vm1785_vm5, %v676_v35, %v666_v31  ;;  %v735_v18 = vsel %vm306_vm7, %v1360_v24, %v1355_v34  ;;  %v1392_v45 = vpack.i.bf16 %v685_v41, %v683_v39  ;;  %v793_v50 = vpack.c.bf16 %v684_v17, %v683_v39 }
 0x38a   : > { %1378 = vrot.lane.b32.xlu1 %v1377_v48, %s1604_s26  ;;  %1383 = vrot.lane.b32.xlu0 %v1382_v38, %s1605_s27  ;;  %v1369_v43 = vpop.permute.xlu0 %1368  ;;  %v1364_v44 = vpop.permute.xlu1 %1363  ;;  %v1397_v49 = vpack.i.bf16 %v686_v42, %v684_v17  ;;  %v794_v26 = vpack.c.bf16 %v686_v42, %v685_v41  ;;  %v717_v52 = vpack.c.bf16 %v680_v47, %v679_v1 }
 0x38b   : > { %1373 = vrot.lane.b32.xlu2 %v1382_v38, %s1604_s26  ;;  %v1371_v25 = vunpack.i.h.bf16 %v1369_v43  ;;  %v1370_v46 = vunpack.i.l.bf16 %v1369_v43  ;;  %v1366_v57 = vunpack.i.h.bf16 %v1364_v44  ;;  %v1365_v58 = vunpack.i.l.bf16 %v1364_v44 }
 0x38c   : > { %v853_v63 = vunpack.c.l.b16 %v793_v50  ;;  %v855_v2 = vunpack.c.l.b16 %v794_v26  ;;  %v718_v15 = vpack.c.bf16 %v682_v37, %v681_v4  ;;  %v833_v16 = vunpack.c.l.b16 %v717_v52 }
 0x38d   : > { %v746_v53 = vsel %vm260_vm6, %v1366_v57, %v1371_v25  ;;  %v748_v54 = vsel %vm260_vm6, %v1371_v25, %v1366_v57  ;;  %v745_v55 = vsel %vm260_vm6, %v1365_v58, %v1370_v46  ;;  %v747_v56 = vsel %vm260_vm6, %v1370_v46, %v1365_v58 }
 0x38e   : > { %v758_v59 = vsel %vm263_vm8, %v745_v55, %v735_v18  ;;  %v760_v60 = vsel %vm263_vm8, %v746_v53, %v736_v12  ;;  %v2009_v19 = vpack.c.b16 %v855_v2, %v853_v63  ;;  %v749_v20 = vsel %vm260_vm6, %v733_v40, %v747_v56 }
 0x38f   : > { %v761_v13 = vpack.c.bf16 %v758_v59, %v733_v40  ;;  %v762_v14 = vpack.c.bf16 %v760_v60, %v734_v33  ;;  %v751_v21 = vsel %vm260_vm6, %v734_v33, %v748_v54  ;;  %v854_v22 = vunpack.c.h.b16 %v793_v50 }
 0x390   : > { %v835_v27 = vunpack.c.l.b16 %v718_v15  ;;  %v753_v6 = vpack.c.bf16 %v745_v55, %v749_v20  ;;  %v754_v29 = vpack.c.bf16 %v746_v53, %v751_v21  ;;  %v856_v61 = vunpack.c.h.b16 %v794_v26 }
 0x391   : > { %v873_v23 = vunpack.c.l.b16 %v761_v13  ;;  %v875_v24 = vunpack.c.l.b16 %v762_v14  ;;  %v874_v5 = vunpack.c.h.b16 %v761_v13  ;;  %v876_v28 = vunpack.c.h.b16 %v762_v14 }
 0x392   : > { %1393 = vrot.lane.b32.xlu1 %v1392_v45, %s1604_s26  ;;  %1398 = vrot.lane.b32.xlu0 %v1397_v49, %s1604_s26  ;;  %v2018_v62 = vpack.c.b16 %v835_v27, %v833_v16  ;;  %v834_v31 = vunpack.c.h.b16 %v717_v52  ;;  %v836_v32 = vunpack.c.h.b16 %v718_v15  ;;  %v813_v33 = vunpack.c.l.b16 %v753_v6 }
 0x393   : > { %1388 = vrot.lane.b32.xlu2 %v1377_v48, %s1605_s27  ;;  %v877_v30 = vpack.c.b16 %v875_v24, %v873_v23  ;;  %v2020_v11 = vpack.c.b16 %v876_v28, %v874_v5  ;;  %v815_v12 = vunpack.c.l.b16 %v754_v29  ;;  %v2022_v34 = vpack.c.b16 %v856_v61, %v854_v22 }
 0x394   : > { %v2024_v35 = vpack.c.b16 %v836_v32, %v834_v31  ;;  %v814_v36 = vunpack.c.h.b16 %v753_v6  ;;  %v816_v0 = vunpack.c.h.b16 %v754_v29 }
 0x395   : > { %905 = vmatpush.bf16.msrb.mxu1 %v877_v30  ;;  %v2026_v3 = vpack.c.b16 %v815_v12, %v813_v33 }
 0x396   : > { %v2028_v47 = vpack.c.b16 %v816_v0, %v814_v36 }
 0x39a   : > { %1408 = vrot.lane.b32.xlu1 %v1397_v49, %s1605_s27 }
 0x39b   : > { %1403 = vrot.lane.b32.xlu2 %v1392_v45, %s1605_s27 }
 0x3e5   : > { %v1374_v37 = vpop.permute.xlu2 %1373 }
 0x3e6   : > { %v1376_v4 = vunpack.i.h.bf16 %v1374_v37  ;;  %v1375_v48 = vunpack.i.l.bf16 %v1374_v37 }
 0x3ed   : > { %v1389_v1 = vpop.permute.xlu2 %1388 }
 0x3ee   : > { %v1391_v18 = vunpack.i.h.bf16 %v1389_v1  ;;  %v1390_v43 = vunpack.i.l.bf16 %v1389_v1 }
 0x3f5   : > { %v1404_v60 = vpop.permute.xlu2 %1403 }
 0x3f6   : > { %v1406_v15 = vunpack.i.h.bf16 %v1404_v60  ;;  %v1405_v16 = vunpack.i.l.bf16 %v1404_v60 }
 0x3fc   : > { %v1379_v38 = vpop.permute.xlu1 %1378  ;;  %v1384_v39 = vpop.permute.xlu0 %1383 }
 0x3fd   : > { %v1381_v40 = vunpack.i.h.bf16 %v1379_v38  ;;  %v1380_v41 = vunpack.i.l.bf16 %v1379_v38  ;;  %v1386_v17 = vunpack.i.h.bf16 %v1384_v39  ;;  %v1385_v42 = vunpack.i.l.bf16 %v1384_v39 }
 0x3ff   : > { %v695_v44 = vsel %vm306_vm7, %v1375_v48, %v1380_v41  ;;  %v696_v25 = vsel %vm306_vm7, %v1376_v4, %v1381_v40  ;;  %v697_v45 = vsel %vm306_vm7, %v1380_v41, %v1375_v48  ;;  %v698_v46 = vsel %vm306_vm7, %v1381_v40, %v1376_v4  ;;  %v1172_v41 = vld [vmem:[#allocation7 + $0x4] sm:$0xf] }
 0x400   : > { %v707_v57 = vsel %vm260_vm6, %v1385_v42, %v1390_v43  ;;  %v708_v58 = vsel %vm260_vm6, %v1386_v17, %v1391_v18  ;;  %v709_v21 = vsel %vm260_vm6, %v1390_v43, %v1385_v42  ;;  %v710_v22 = vsel %vm260_vm6, %v1391_v18, %v1386_v17  ;;  %v1158_v17 = vld [vmem:[#allocation7 + $0x8] sm:$0xf0] }
 0x401   : > { %v720_v49 = vsel %vm263_vm8, %v707_v57, %v697_v45  ;;  %v722_v50 = vsel %vm263_vm8, %v708_v58, %v698_v46  ;;  %v711_v4 = vsel %vm260_vm6, %v695_v44, %v709_v21 }
 0x402   : > { %v2048_v26 = vpack.c.bf16 %v720_v49, %v695_v44  ;;  %v2050_v52 = vpack.c.bf16 %v722_v50, %v696_v25  ;;  %v715_v46 = vpack.c.bf16 %v707_v57, %v711_v4  ;;  %v1161_v50 = vor.u32 %v1172_v41, %v1158_v17  ;;  %v1156_v57 = vld [vmem:[#allocation7] sm:$0xf] }
 0x404   : > { %v1394_v53 = vpop.permute.xlu1 %1393  ;;  %v863_v54 = vunpack.c.l.b16 %v2048_v26  ;;  %v865_v55 = vunpack.c.l.b16 %v2050_v52  ;;  %v1399_v59 = vpop.permute.xlu0 %1398  ;;  %v864_v7 = vunpack.c.h.b16 %v2048_v26  ;;  %v866_v44 = vunpack.c.h.b16 %v2050_v52 }
 0x405   : > { %v1396_v63 = vunpack.i.h.bf16 %v1394_v53  ;;  %v1395_v2 = vunpack.i.l.bf16 %v1394_v53  ;;  %v1401_v13 = vunpack.i.h.bf16 %v1399_v59  ;;  %v1400_v14 = vunpack.i.l.bf16 %v1399_v59 }
 0x406   : > { %v867_v56 = vpack.c.b16 %v865_v55, %v863_v54 }
 0x407   : > { %v772_v27 = vsel %vm306_vm7, %v1396_v63, %v1401_v13  ;;  %v774_v5 = vsel %vm306_vm7, %v1401_v13, %v1396_v63  ;;  %v771_v28 = vsel %vm306_vm7, %v1395_v2, %v1400_v14 }
 0x408   : > { %906 = vmatpush.bf16.msrb.mxu1 %v867_v56  ;;  %v804_v56 = vunpack.c.h.b16 %v715_v46 }
 0x40c   : > { %907 = vmatpush.bf16.msrb.mxu1 %v2009_v19  ;;  %v1409_v20 = vpop.permute.xlu1 %1408  ;;  %v773_v19 = vsel %vm306_vm7, %v1400_v14, %v1395_v2 }
 0x40d   : > { %v1411_v23 = vunpack.i.h.bf16 %v1409_v20  ;;  %v1410_v24 = vunpack.i.l.bf16 %v1409_v20 }
 0x40f   : > { %v783_v6 = vsel %vm260_vm6, %v1405_v16, %v1410_v24  ;;  %v784_v29 = vsel %vm260_vm6, %v1406_v15, %v1411_v23  ;;  %v785_v61 = vsel %vm260_vm6, %v1410_v24, %v1405_v16  ;;  %v786_v30 = vsel %vm260_vm6, %v1411_v23, %v1406_v15 }
 0x410   : > { %908 = vmatpush.bf16.msrb.mxu1 %v1945_v8  ;;  %v787_v31 = vsel %vm260_vm6, %v771_v28, %v785_v61  ;;  %v789_v32 = vsel %vm260_vm6, %v772_v27, %v786_v30  ;;  %v796_v33 = vsel %vm263_vm8, %v783_v6, %v773_v19  ;;  %v798_v12 = vsel %vm263_vm8, %v784_v29, %v774_v5 }
 0x411   : > { %v791_v36 = vpack.c.bf16 %v783_v6, %v787_v31  ;;  %v792_v0 = vpack.c.bf16 %v784_v29, %v789_v32  ;;  %v799_v37 = vpack.c.bf16 %v796_v33, %v771_v28  ;;  %v800_v1 = vpack.c.bf16 %v798_v12, %v772_v27 }
 0x412   : > { %v713_v8 = vsel %vm260_vm6, %v696_v25, %v710_v22  ;;  %v803_v25 = vunpack.c.l.b16 %v715_v46 }
 0x413   : > { %v823_v48 = vunpack.c.l.b16 %v791_v36  ;;  %v825_v38 = vunpack.c.l.b16 %v792_v0  ;;  %v883_v39 = vunpack.c.l.b16 %v799_v37  ;;  %v885_v40 = vunpack.c.l.b16 %v800_v1 }
 0x414   : > { %909 = vmatpush.bf16.msrb.mxu1 %v2018_v62  ;;  %v884_v10 = vunpack.c.h.b16 %v799_v37  ;;  %v886_v42 = vunpack.c.h.b16 %v800_v1  ;;  %v716_v49 = vpack.c.bf16 %v708_v58, %v713_v8  ;;  %v868_v62 = vpack.c.b16 %v866_v44, %v864_v7  ;;  %v1173_v58 = vld [vmem:[#allocation7 + $0x4] sm:$0xf0]  ;;  %v1431_v7 = vld [vmem:[%s1730_s30 + $0x8] sm:$0xff] }
 0x415   : > { %v827_v18 = vpack.c.b16 %v825_v38, %v823_v48  ;;  %v887_v43 = vpack.c.b16 %v885_v40, %v883_v39  ;;  %v1157_v26 = vor.u32 %v1173_v58, %v1156_v57  ;;  %v826_v52 = vunpack.c.h.b16 %v792_v0 }
 0x416   : > { %v888_v45 = vpack.c.b16 %v886_v42, %v884_v10  ;;  %v805_v53 = vunpack.c.l.b16 %v716_v49  ;;  %v806_v59 = vunpack.c.h.b16 %v716_v49  ;;  %v1430_v49 = vld [vmem:[%s1730_s30] sm:$0xff] }
 0x417   : > { %926 = vmatpush.bf16.msra.mxu3 %v887_v43 }
 0x418   : > { %910 = vmatpush.bf16.msrb.mxu1 %v827_v18  ;;  %954 = vmatpush.bf16.msrb.mxu0 %v888_v45  ;;  %v807_v54 = vpack.c.b16 %v805_v53, %v803_v25 }
 0x41a   : > { %1162 = vmatmul.msk.bf16.vlgmr.msra.gmra.mxu3 %vm514_vm9, %v1161_v50 }
 0x41b   : > { %933 = vmatpush.bf16.msrb.mxu3 %v2020_v11  ;;  %1163 = vmatmul.msk.bf16.vlgmr.msrb.gmra.mxu0 %vm514_vm9, %v1161_v50  ;;  %v824_v11 = vunpack.c.h.b16 %v791_v36 }
 0x41c   : > { %911 = vmatpush.bf16.msrb.mxu1 %v2026_v3  ;;  %v808_v3 = vpack.c.b16 %v806_v59, %v804_v56 }
 0x41d   : > { %v828_v55 = vpack.c.b16 %v826_v52, %v824_v11  ;;  %v1433_v11 = vld [vmem:[%s1730_s30 + $0x18] sm:$0xff] }
 0x41f   : > { %934 = vmatpush.bf16.msrb.mxu3 %v868_v62 }
 0x420   : > { %912 = vmatpush.bf16.msrb.mxu1 %v807_v54  ;;  %v1432_v54 = vld [vmem:[%s1730_s30 + $0x10] sm:$0xff] }
 0x423   : > { %935 = vmatpush.bf16.msrb.mxu3 %v2022_v34  ;;  %913 = vmatmul.bf16.vlgmr.msrb.gmra.mxu1 %v1157_v26 }
 0x427   : > { %936 = vmatpush.bf16.msrb.mxu3 %v1947_v9 }
 0x42b   : > { %937 = vmatpush.bf16.msrb.mxu3 %v2024_v35 }
 0x42f   : > { %938 = vmatpush.bf16.msrb.mxu3 %v828_v55 }
 0x433   : > { %939 = vmatpush.bf16.msrb.mxu3 %v2028_v47 }
 0x437   : > { %940 = vmatpush.bf16.msrb.mxu3 %v808_v3 }
 0x43a   : > { %941 = vmatmul.bf16.vlgmr.msrb.gmra.mxu3 %v1157_v26 }
 0x498   : > { %v956_v34 = vpop.f32.mrf.mxu0 }
 0x49d   : > { %v928_v60 = vpop.f32.mrf.mxu3 }
 0x4a0   : > { %v914_v2 = vpop.f32.mrf.mxu1  ;;  %v958_v35 = vpop.f32.mrf.mxu0 }
 0x4a1   : > { %v929_v14 = vadd.f32 %v928_v60, %v914_v2 }
 0x4a5   : > { %v930_v63 = vpop.f32.mrf.mxu3 }
 0x4a8   : > { %v916_v16 = vpop.f32.mrf.mxu1 }
 0x4a9   : > { %v931_v21 = vadd.f32 %v930_v63, %v916_v16 }
 0x4bd   : > { %v942_v13 = vpop.f32.mrf.mxu3 }
 0x4be   : > { %v957_v9 = vadd.f32 %v956_v34, %v942_v13 }
 0x4c0   : > { %v961_v15 = vadd.f32 %v957_v9, %v929_v14 }
 0x4c2   : > { %962 = vadd.xlane.f32.xlu0 %v961_v15 }
 0x4c5   : > { %v944_v20 = vpop.f32.mrf.mxu3 }
 0x4c6   : > { %v959_v22 = vadd.f32 %v958_v35, %v944_v20 }
 0x4c8   : > { %v964_v23 = vadd.f32 %v959_v22, %v931_v21 }
 0x4ca   : > { %965 = vadd.xlane.f32.xlu2 %v964_v23 }
 0x535   : > { %v963_v47 = vpop.xlane.xlu0 %962 }
 0x536   : > { %v967_v24 = vmul.f32 %v963_v47, %v1936_v51 }
 0x538   : > { %v969_v27 = vsub.f32 %v929_v14, %v967_v24  ;;  %v970_v5 = vsub.f32 %v957_v9, %v967_v24 }
 0x53a   : > { %v973_v28 = vmul.f32 %v969_v27, %v969_v27  ;;  %v974_v19 = vmul.f32 %v970_v5, %v970_v5 }
 0x53c   : > { %v977_v6 = vadd.f32 %v974_v19, %v973_v28 }
 0x53d   : > { %v966_v29 = vpop.xlane.xlu2 %965 }
 0x53e   : > { %v968_v61 = vmul.f32 %v966_v29, %v1936_v51  ;;  %978 = vadd.xlane.f32.xlu1 %v977_v6 }
 0x540   : > { %v971_v30 = vsub.f32 %v931_v21, %v968_v61  ;;  %v972_v31 = vsub.f32 %v959_v22, %v968_v61 }
 0x542   : > { %v975_v32 = vmul.f32 %v971_v30, %v971_v30  ;;  %v976_v33 = vmul.f32 %v972_v31, %v972_v31 }
 0x544   : > { %v980_v12 = vadd.f32 %v976_v33, %v975_v32 }
 0x546   : > { %981 = vadd.xlane.f32.xlu0 %v980_v12 }
 0x5b1   : > { %v979_v36 = vpop.xlane.xlu1 %978 }
 0x5b2   : > { %v983_v0 = vmul.f32 %v979_v36, %v1936_v51 }
 0x5b4   : > { %v985_v37 = vadd.f32 1e-05, %v983_v0 }
 0x5b6   : > { %1426 = vrsqrt.f32 %v985_v37  ;;  %vm993_vm1 = vweird.f32 %v985_v37 }
 0x5b9   : > { %v982_v1 = vpop.xlane.xlu0 %981 }
 0x5ba   : > { %v984_v4 = vmul.f32 %v982_v1, %v1936_v51 }
 0x5bc   : > { %v1427_v8 = vpop.eup %1426  ;;  %v986_v48 = vadd.f32 1e-05, %v984_v4 }
 0x5bd   : > { %v988_v38 = vmul.f32 %v1427_v8, %v985_v37  ;;  %vm994_vm0 = vweird.f32 %v1427_v8 }
 0x5be   : > { %1428 = vrsqrt.f32 %v986_v48  ;;  %vm995_vm2 = vmor %vm993_vm1, %vm994_vm0  ;;  %vm1003_vm4 = vweird.f32 %v986_v48 }
 0x5bf   : > { %v989_v39 = vmul.f32 %v1427_v8, %v988_v38 }
 0x5c1   : > { %v990_v40 = vmul.f32 0.5, %v989_v39 }
 0x5c3   : > { %v991_v41 = vsub.f32 1.5, %v990_v40 }
 0x5c4   : > { %v1429_v17 = vpop.eup %1428 }
 0x5c5   : > { %v992_v10 = vmul.f32 %v1427_v8, %v991_v41  ;;  %v998_v42 = vmul.f32 %v1429_v17, %v986_v48  ;;  %vm1004_vm3 = vweird.f32 %v1429_v17 }
 0x5c6   : > { %vm1005_vm5 = vmor %vm1003_vm4, %vm1004_vm3 }
 0x5c7   : > { %v996_v18 = vsel %vm995_vm2, %v1427_v8, %v992_v10  ;;  %v999_v43 = vmul.f32 %v1429_v17, %v998_v42 }
 0x5c8   : > { %v1007_v51 = vmul.f32 %v996_v18, %v969_v27  ;;  %v1008_v45 = vmul.f32 %v996_v18, %v970_v5 }
 0x5c9   : > { %v1000_v46 = vmul.f32 0.5, %v999_v43 }
 0x5ca   : > { %v1011_v50 = vadd.f32 %v1430_v49, %v1007_v51  ;;  %v1012_v44 = vadd.f32 %v1431_v7, %v1008_v45 }
 0x5cb   : > { %v1001_v25 = vsub.f32 1.5, %v1000_v46 }
 0x5cc   : > { %1015 = vst [vmem:[%s223_s29] sm:$0xff] %v1011_v50 }
 0x5cd   : > { %1016 = vst [vmem:[%s223_s29 + $0x8] sm:$0xff] %v1012_v44  ;;  %v1002_v53 = vmul.f32 %v1429_v17, %v1001_v25 }
 0x5cf   : > { %v1006_v62 = vsel %vm1005_vm5, %v1429_v17, %v1002_v53 }
 0x5d0   : > { %v1009_v57 = vmul.f32 %v1006_v62, %v971_v30  ;;  %v1010_v58 = vmul.f32 %v1006_v62, %v972_v31 }
 0x5d2   : > { %v1013_v26 = vadd.f32 %v1432_v54, %v1009_v57  ;;  %v1014_v52 = vadd.f32 %v1433_v11, %v1010_v58 }
 0x5d4   : > { %1017 = vst [vmem:[%s223_s29 + $0x10] sm:$0xff] %v1013_v26 }
 0x5d5   : > { %1018 = vst [vmem:[%s223_s29 + $0x18] sm:$0xff] %v1014_v52 }
 0x5d6   : > { %1551 = shalt.err (!%p1548_p10)
}
 0x5d7   : > { %s1607_s22 = smov 256  }
 0x5d8   : > { %1185 = dma.vmem_to_hbm [thread:$0]  (%p1694_p3), %s1033_s8, 512, %s1035_s16, %s1020_s17, %s1607_s22, %s1607_s22, %s1605_s27  }
 0x5d9 PF: > { %s1049_s30 = sand.u32 1, %s1582_s12   ;;  %p2160_p12 = scmp.ge.s32.totalorder %s1594_s15, 2 }
 0x5da   : > { %s1050_s26 = scalar_lea.sflag [#allocation4], %s1049_s30 }
 0x5db   : > { %p1199_p13 = pnand %p2160_p12, %p1663_p6 }
 0x5dd   : > { %p1200_p0 = pneg %p1199_p13 }
 0x5df   : > { %1577 = dma.done.wait (%p1200_p0), %s1050_s26, 512  }
 0x5e0   : > { %1579 = vsyncadd (%p1200_p0), %s1050_s26, 4294966784  ;;  %p17_p5 = scmp.ge.s32.totalorder %s1684_s6, 4   ;;  %s2161_s12 = smov %s1586_s13 }
 0x5e1   : > { %s2162_s13 = smov %s1590_s14  ;;  %s2163_s14 = smov %s1700_s10 }
 0x5e2   : > { %s2164_s15 = smov %s1684_s6  ;;  %19 = sbr.rel (!%p17_p5) target bundleno = 6 (0x6), region = 85 }
 0x5e7   :  { %1056 = vsyncpa [#allocation3], 1 }
 0x5e8   :  { %1058 = vsyncpa [#allocation3 + $0x1], 1 }
 0x5e9   :  { %1059 = vsyncpa [#allocation6], 1 }
 0x5ea   :  { %1060 = vsyncpa [#allocation4], 1 }
 0x5eb   :  { %1062 = vsyncpa [#allocation4 + $0x1], 1 }

</bundles_post_ra>
